<compile_context>
chip_gen: v7x
topology: tpu7x:2x2x1
jax: 0.10.0
libtpu: 0.0.40
codegen_flags: <defaults>
</compile_context>

<pallas_src>
import jax
import jax.numpy as jnp
from jax.experimental import pallas as pl
from jax.experimental.pallas import tpu as pltpu


_BN_EPS = 1e-5


def _model_kernel(x_ref, w1a_ref, w1b_ref, ga_ref, gb_ref, ba_ref, bb_ref,
                  w2_ref, b2_ref, o_ref):
    x = x_ref[...]                                                    # [B, F]
    batch = x.shape[0]

    # ---- Linear 1 split into GLU a/b halves (MXU). Bias omitted: BN's
    #      batch-mean subtraction makes a constant pre-BN bias a no-op. ----
    ha = jnp.dot(x, w1a_ref[...], preferred_element_type=jnp.float32)  # [B, 2F]
    hb = jnp.dot(x, w1b_ref[...], preferred_element_type=jnp.float32)  # [B, 2F]

    # One-pass batch statistics via the MXU: mean = (1/B)*ones @ h,
    # E[h^2] = (1/B)*ones @ (h*h); var = E[h^2] - mean^2 (f32 accumulation).
    inv_b = jnp.full((1, batch), 1.0 / batch, dtype=jnp.float32)

    def bn_half(h, gamma, beta):
        mean = jnp.dot(inv_b, h, preferred_element_type=jnp.float32)        # [1, 2F]
        mean_sq = jnp.dot(inv_b, h * h, preferred_element_type=jnp.float32) # [1, 2F]
        var = mean_sq - mean * mean
        s = gamma * jax.lax.rsqrt(var + _BN_EPS)   # folded BN scale   [1, 2F]
        t = beta - mean * s                        # folded BN shift   [1, 2F]
        return h * s + t                           # one mul + one add per element

    a = bn_half(ha, ga_ref[...], ba_ref[...])      # [B, 2F]
    b = bn_half(hb, gb_ref[...], bb_ref[...])      # [B, 2F]

    # ---- GLU: a * sigmoid(b) (sigmoid runs on the EUP slot) ----
    g = a * jax.nn.sigmoid(b)                      # [B, 2F]

    # ---- Linear 2: 2F -> C (MXU) ----
    y = jnp.dot(g, w2_ref[...], preferred_element_type=jnp.float32)   # [B, C]
    o_ref[...] = (y + b2_ref[...]).astype(o_ref.dtype)


def prepare_params(w1, b1, gamma, beta, w2, b2):
    """One-time parameter prep, hoisted out of the per-call path.

    PyTorch Linear weights are [out, in]; transpose to [in, out]. The first
    layer (and the BN affine params) are split into GLU a/b halves so the
    kernel never slices across a lane boundary. b1 is dropped (absorbed by BN).
    NOTE: BatchNorm running_mean/running_var are not updated (forward output
    only, matching the module's returned value in training mode).
    """
    del b1  # mathematically a no-op before BatchNorm's mean subtraction
    hidden = w1.shape[0]            # 4F
    half = hidden // 2              # 2F
    w1_t = jnp.transpose(w1)        # [F, 4F]
    return dict(
        w1a=w1_t[:, :half],                        # [F, 2F]
        w1b=w1_t[:, half:],                        # [F, 2F]
        gamma_a=gamma[:half].reshape(1, -1),       # [1, 2F]
        gamma_b=gamma[half:].reshape(1, -1),
        beta_a=beta[:half].reshape(1, -1),
        beta_b=beta[half:].reshape(1, -1),
        w2_t=jnp.transpose(w2),                    # [2F, C]
        b2=b2.reshape(1, -1),                      # [1, C]
    )


@jax.jit
def self_defined_model(x, params):
    """x: [B, F] float32; params from prepare_params()."""
    B = x.shape[0]
    C = params["w2_t"].shape[1]
    vmem = pl.BlockSpec(memory_space=pltpu.MemorySpace.VMEM)
    return pl.pallas_call(
        _model_kernel,
        out_shape=jax.ShapeDtypeStruct((B, C), jnp.float32),
        # Small problem: every operand fits VMEM as a single full-array block.
        in_specs=[vmem] * 9,
        out_specs=vmem,
    )(x, params["w1a"], params["w1b"],
      params["gamma_a"], params["gamma_b"],
      params["beta_a"], params["beta_b"],
      params["w2_t"], params["b2"])


if __name__ == "__main__":
    # Small shapes consistent with the module.
    batch = 8
    in_features = 32
    num_classes = 10

    key = jax.random.PRNGKey(0)
    kx, kw1, kb1, kw2, kb2 = jax.random.split(key, 5)

    x = jax.random.normal(kx, (batch, in_features), dtype=jnp.float32)

    # Deterministic parameter init (PyTorch shapes: Linear weight is [out, in]).
    bound1 = 1.0 / (in_features ** 0.5)
    w1 = jax.random.uniform(kw1, (in_features * 4, in_features),
                            minval=-bound1, maxval=bound1, dtype=jnp.float32)
    b1 = jax.random.uniform(kb1, (in_features * 4,),
                            minval=-bound1, maxval=bound1, dtype=jnp.float32)

    gamma = jnp.ones((in_features * 4,), dtype=jnp.float32)   # BN affine defaults
    beta = jnp.zeros((in_features * 4,), dtype=jnp.float32)

    bound2 = 1.0 / ((in_features * 2) ** 0.5)
    w2 = jax.random.uniform(kw2, (num_classes, in_features * 2),
                            minval=-bound2, maxval=bound2, dtype=jnp.float32)
    b2 = jax.random.uniform(kb2, (num_classes,),
                            minval=-bound2, maxval=bound2, dtype=jnp.float32)

    params = prepare_params(w1, b1, gamma, beta, w2, b2)
    out = self_defined_model(x, params)
    jax.block_until_ready(out)

    # Pure-JAX reference (full PyTorch math, *including* b1 and two-pass BN)
    # to confirm the algebraic simplifications are exact.
    h_ref = x @ w1.T + b1
    m = h_ref.mean(axis=0, keepdims=True)
    v = ((h_ref - m) ** 2).mean(axis=0, keepdims=True)
    h_ref = (h_ref - m) / jnp.sqrt(v + 1e-5) * gamma + beta
    half = h_ref.shape[1] // 2
    g_ref = h_ref[:, :half] * jax.nn.sigmoid(h_ref[:, half:])
    y_ref = g_ref @ w2.T + b2
    assert jnp.allclose(out, y_ref, atol=1e-4, rtol=1e-4)

    print("KERNEL_OK")
</pallas_src>

<mosaic_0001>
module attributes {stable_mosaic.version = 11 : i64} {
  func.func @_model_kernel(%arg0: memref<8x32xf32, #tpu.memory_space<vmem>>, %arg1: memref<32x64xf32, #tpu.memory_space<vmem>>, %arg2: memref<32x64xf32, #tpu.memory_space<vmem>>, %arg3: memref<1x64xf32, #tpu.memory_space<vmem>>, %arg4: memref<1x64xf32, #tpu.memory_space<vmem>>, %arg5: memref<1x64xf32, #tpu.memory_space<vmem>>, %arg6: memref<1x64xf32, #tpu.memory_space<vmem>>, %arg7: memref<64x10xf32, #tpu.memory_space<vmem>>, %arg8: memref<1x10xf32, #tpu.memory_space<vmem>>, %arg9: memref<8x10xf32, #tpu.memory_space<vmem>>) attributes {dimension_semantics = [], scalar_prefetch = 0 : i64, scratch_operands = 0 : i64, tpu.core_type = #tpu.core_type<tc>} {
    %c0 = arith.constant 0 : index
    %c0_0 = arith.constant 0 : index
    %0 = vector.load %arg0[%c0, %c0_0] : memref<8x32xf32, #tpu.memory_space<vmem>>, vector<8x32xf32>
    %c0_1 = arith.constant 0 : index
    %c0_2 = arith.constant 0 : index
    %1 = vector.load %arg1[%c0_1, %c0_2] : memref<32x64xf32, #tpu.memory_space<vmem>>, vector<32x64xf32>
    %cst = arith.constant dense<0.000000e+00> : vector<8x64xf32>
    %2 = tpu.matmul %0, %1, %cst {dimension_numbers = #tpu.dot_dimension_numbers<[1], [0], [0], [1], [0, 0, 1, 1], [], []>} : vector<8x32xf32>, vector<32x64xf32>, vector<8x64xf32> -> vector<8x64xf32>
    %c0_3 = arith.constant 0 : index
    %c0_4 = arith.constant 0 : index
    %3 = vector.load %arg2[%c0_3, %c0_4] : memref<32x64xf32, #tpu.memory_space<vmem>>, vector<32x64xf32>
    %cst_5 = arith.constant dense<0.000000e+00> : vector<8x64xf32>
    %4 = tpu.matmul %0, %3, %cst_5 {dimension_numbers = #tpu.dot_dimension_numbers<[1], [0], [0], [1], [0, 0, 1, 1], [], []>} : vector<8x32xf32>, vector<32x64xf32>, vector<8x64xf32> -> vector<8x64xf32>
    %cst_6 = arith.constant 1.250000e-01 : f32
    %5 = vector.broadcast %cst_6 : f32 to vector<1x8xf32>
    %c0_7 = arith.constant 0 : index
    %c0_8 = arith.constant 0 : index
    %6 = vector.load %arg3[%c0_7, %c0_8] : memref<1x64xf32, #tpu.memory_space<vmem>>, vector<1x64xf32>
    %c0_9 = arith.constant 0 : index
    %c0_10 = arith.constant 0 : index
    %7 = vector.load %arg5[%c0_9, %c0_10] : memref<1x64xf32, #tpu.memory_space<vmem>>, vector<1x64xf32>
    %cst_11 = arith.constant dense<0.000000e+00> : vector<1x64xf32>
    %8 = tpu.matmul %5, %2, %cst_11 {dimension_numbers = #tpu.dot_dimension_numbers<[1], [0], [0], [1], [0, 0, 1, 1], [], []>} : vector<1x8xf32>, vector<8x64xf32>, vector<1x64xf32> -> vector<1x64xf32>
    %9 = arith.mulf %2, %2 : vector<8x64xf32>
    %cst_12 = arith.constant dense<0.000000e+00> : vector<1x64xf32>
    %10 = tpu.matmul %5, %9, %cst_12 {dimension_numbers = #tpu.dot_dimension_numbers<[1], [0], [0], [1], [0, 0, 1, 1], [], []>} : vector<1x8xf32>, vector<8x64xf32>, vector<1x64xf32> -> vector<1x64xf32>
    %11 = arith.mulf %8, %8 : vector<1x64xf32>
    %12 = arith.subf %10, %11 : vector<1x64xf32>
    %cst_13 = arith.constant 9.99999974E-6 : f32
    %13 = vector.broadcast %cst_13 : f32 to vector<1x64xf32>
    %14 = arith.addf %12, %13 : vector<1x64xf32>
    %15 = math.rsqrt %14 : vector<1x64xf32>
    %16 = arith.mulf %6, %15 : vector<1x64xf32>
    %17 = arith.mulf %8, %16 : vector<1x64xf32>
    %18 = arith.subf %7, %17 : vector<1x64xf32>
    %19 = vector.broadcast %16 : vector<1x64xf32> to vector<8x64xf32>
    %20 = arith.mulf %2, %19 : vector<8x64xf32>
    %21 = vector.broadcast %18 : vector<1x64xf32> to vector<8x64xf32>
    %22 = arith.addf %20, %21 : vector<8x64xf32>
    %c0_14 = arith.constant 0 : index
    %c0_15 = arith.constant 0 : index
    %23 = vector.load %arg4[%c0_14, %c0_15] : memref<1x64xf32, #tpu.memory_space<vmem>>, vector<1x64xf32>
    %c0_16 = arith.constant 0 : index
    %c0_17 = arith.constant 0 : index
    %24 = vector.load %arg6[%c0_16, %c0_17] : memref<1x64xf32, #tpu.memory_space<vmem>>, vector<1x64xf32>
    %cst_18 = arith.constant dense<0.000000e+00> : vector<1x64xf32>
    %25 = tpu.matmul %5, %4, %cst_18 {dimension_numbers = #tpu.dot_dimension_numbers<[1], [0], [0], [1], [0, 0, 1, 1], [], []>} : vector<1x8xf32>, vector<8x64xf32>, vector<1x64xf32> -> vector<1x64xf32>
    %26 = arith.mulf %4, %4 : vector<8x64xf32>
    %cst_19 = arith.constant dense<0.000000e+00> : vector<1x64xf32>
    %27 = tpu.matmul %5, %26, %cst_19 {dimension_numbers = #tpu.dot_dimension_numbers<[1], [0], [0], [1], [0, 0, 1, 1], [], []>} : vector<1x8xf32>, vector<8x64xf32>, vector<1x64xf32> -> vector<1x64xf32>
    %28 = arith.mulf %25, %25 : vector<1x64xf32>
    %29 = arith.subf %27, %28 : vector<1x64xf32>
    %cst_20 = arith.constant 9.99999974E-6 : f32
    %30 = vector.broadcast %cst_20 : f32 to vector<1x64xf32>
    %31 = arith.addf %29, %30 : vector<1x64xf32>
    %32 = math.rsqrt %31 : vector<1x64xf32>
    %33 = arith.mulf %23, %32 : vector<1x64xf32>
    %34 = arith.mulf %25, %33 : vector<1x64xf32>
    %35 = arith.subf %24, %34 : vector<1x64xf32>
    %36 = vector.broadcast %33 : vector<1x64xf32> to vector<8x64xf32>
    %37 = arith.mulf %4, %36 : vector<8x64xf32>
    %38 = vector.broadcast %35 : vector<1x64xf32> to vector<8x64xf32>
    %39 = arith.addf %37, %38 : vector<8x64xf32>
    %40 = arith.negf %39 : vector<8x64xf32>
    %41 = math.exp %40 : vector<8x64xf32>
    %cst_21 = arith.constant 1.000000e+00 : f32
    %42 = vector.broadcast %cst_21 : f32 to vector<8x64xf32>
    %43 = arith.addf %42, %41 : vector<8x64xf32>
    %44 = arith.divf %42, %43 : vector<8x64xf32>
    %45 = arith.mulf %22, %44 : vector<8x64xf32>
    %c0_22 = arith.constant 0 : index
    %c0_23 = arith.constant 0 : index
    %46 = vector.load %arg7[%c0_22, %c0_23] : memref<64x10xf32, #tpu.memory_space<vmem>>, vector<64x10xf32>
    %cst_24 = arith.constant dense<0.000000e+00> : vector<8x10xf32>
    %47 = tpu.matmul %45, %46, %cst_24 {dimension_numbers = #tpu.dot_dimension_numbers<[1], [0], [0], [1], [0, 0, 1, 1], [], []>} : vector<8x64xf32>, vector<64x10xf32>, vector<8x10xf32> -> vector<8x10xf32>
    %c0_25 = arith.constant 0 : index
    %c0_26 = arith.constant 0 : index
    %48 = vector.load %arg8[%c0_25, %c0_26] : memref<1x10xf32, #tpu.memory_space<vmem>>, vector<1x10xf32>
    %49 = vector.broadcast %48 : vector<1x10xf32> to vector<8x10xf32>
    %50 = arith.addf %47, %49 : vector<8x10xf32>
    %c0_27 = arith.constant 0 : index
    %c0_28 = arith.constant 0 : index
    %51 = vector.load %arg9[%c0_27, %c0_28] : memref<8x10xf32, #tpu.memory_space<vmem>>, vector<8x10xf32>
    tpu.vector_store %arg9[%c0_27, %c0_28], %50 {strides = array<i32>} : memref<8x10xf32, #tpu.memory_space<vmem>>, vector<8x10xf32>,
    return
  }
}

</mosaic_0001>

<bundles_post_ra>
// kernel: self_defined_model.1
= control target key start
LH: loop header
LB: loop body
LE: loop exit
PB: predicated region body
PF: predicated region fallthrough
CT: control target
= control target key end

     0   :  { %v788_v3 = vmov 0.0|0.0   ;;  %vm789_vm0 = vmmov 0   ;;  %v790_v6 = vmov 0.0   ;;  %s952_s0 = inlined_call_operand.vmem [shape: f32[8,32], index: 0, kind: input, shape index: {}]   ;;  %s953_s1 = inlined_call_operand.vmem [shape: f32[32,64], index: 1, kind: input, shape index: {}]   ;;  %s954_s2 = inlined_call_operand.vmem [shape: f32[32,64], index: 2, kind: input, shape index: {}]   ;;  %s955_s3 = inlined_call_operand.vmem [shape: f32[1,64], index: 3, kind: input, shape index: {}]   ;;  %s956_s4 = inlined_call_operand.vmem [shape: f32[1,64], index: 4, kind: input, shape index: {}]   ;;  %s957_s5 = inlined_call_operand.vmem [shape: f32[1,64], index: 5, kind: input, shape index: {}]   ;;  %s958_s6 = inlined_call_operand.vmem [shape: f32[1,64], index: 6, kind: input, shape index: {}]   ;;  %s959_s7 = inlined_call_operand.vmem [shape: f32[64,10], index: 7, kind: input, shape index: {}]   ;;  %s960_s8 = inlined_call_operand.vmem [shape: f32[1,10], index: 8, kind: input, shape index: {}]   ;;  %s961_s9 = inlined_call_operand.hbm [shape: f32[8,10], index: 9, kind: output, shape index: {}]  }
   0x1   :  { %v34_v0 = vld [vmem:[%s953_s1] sm:$0xff]  ;;  %v35_v1 = vld [vmem:[%s953_s1 + $0x8] sm:$0xff]  ;;  %v36_v2 = vld [vmem:[%s953_s1 + $0x10] sm:$0xff]  ;;  %727 = vmatprep.subr.bf16.mxu1 %v788_v3  ;;  %674 = vmatprep.mubr.msk.f32.mxu1 %vm789_vm0, %v790_v6 }
   0x2   :  { %v728_v4 = vpack.c.bf16 %v35_v1, %v34_v0  ;;  %v37_v5 = vld [vmem:[%s953_s1 + $0x18] sm:$0xff]  ;;  %688 = vmatprep.subr.mxu0 %v790_v6  ;;  %690 = vmatprep.mubr.msk.f32.mxu0 %vm789_vm0, %v790_v6 }
   0x3   :  { %v731_v7 = vpack.c.bf16 %v37_v5, %v36_v2 }
   0x4   :  { %729 = vmatpush3.bf16.msra.mxu1 %v728_v4 }
   0x5   :  { %14 = vsyncpa [#allocation3], 0  ;;  %730 = vmatprep.subr.bf16.mxu1 %v788_v3  ;;  %v112_v8 = vld [vmem:[%s954_s2] sm:$0xff]  ;;  %v113_v9 = vld [vmem:[%s954_s2 + $0x8] sm:$0xff]  ;;  %vm38_vm1 = vcmask 261120   ;;  %vm188_vm2 = vcmask 64512   ;;  %v341_v41 = vlaneseq }
   0x6   :  { %v33_v10 = vld [vmem:[%s952_s0] sm:$0xff]  ;;  %v734_v11 = vpack.c.bf16 %v113_v9, %v112_v8  ;;  %v114_v12 = vld [vmem:[%s954_s2 + $0x10] sm:$0xff]  ;;  %v115_v13 = vld [vmem:[%s954_s2 + $0x18] sm:$0xff]  ;;  %v791_v18 = vmov 0.125   ;;  %vm540_vm3 = vcmask 523264   ;;  %vm614_vm4 = vcmask 80896  }
   0x7   :  { %v737_v14 = vpack.c.bf16 %v115_v13, %v114_v12  ;;  %v525_v22 = vld [vmem:[%s959_s7] sm:$0xff]  ;;  %v526_v23 = vld [vmem:[%s959_s7 + $0x8] sm:$0xff]  ;;  %v527_v25 = vld [vmem:[%s959_s7 + $0x10] sm:$0xff]  ;;  %v342_v48 = vshrl.u32 %v341_v41, 7 }
   0x8   :  { %732 = vmatpush3.bf16.msra.mxu1 %v731_v7  ;;  %v740_v24 = vpack.c.bf16 %v526_v23, %v525_v22  ;;  %v528_v26 = vld [vmem:[%s959_s7 + $0x18] sm:$0xff]  ;;  %v529_v28 = vld [vmem:[%s959_s7 + $0x20] sm:$0xff]  ;;  %v530_v29 = vld [vmem:[%s959_s7 + $0x28] sm:$0xff] }
   0x9   :  { %733 = vmatprep.subr.bf16.mxu1 %v788_v3  ;;  %v743_v27 = vpack.c.bf16 %v528_v26, %v527_v25  ;;  %v746_v30 = vpack.c.bf16 %v530_v29, %v529_v28  ;;  %v531_v31 = vld [vmem:[%s959_s7 + $0x30] sm:$0xff]  ;;  %v532_v32 = vld [vmem:[%s959_s7 + $0x38] sm:$0xff]  ;;  %v186_v50 = vld [vmem:[%s955_s3] sm:$0x1]  ;;  %v343_v51 = vsub.s32 0, %v342_v48 }
   0xa   :  { %v749_v33 = vpack.c.bf16 %v532_v32, %v531_v31  ;;  %v187_v54 = vld [vmem:[%s957_s5] sm:$0x1] }
   0xb   :  { %675 = vmatmul.mubr.msk.f32.vlgmr.msra.gmra.mrb[0].mxu1 %vm38_vm1, %v33_v10  ;;  %v354_v59 = vld [vmem:[%s956_s4] sm:$0x1] }
   0xc   :  { %735 = vmatpush3.bf16.msra.mxu1 %v734_v11  ;;  %685 = vmatprep.mubr.msk.f32.mxu1 %vm789_vm0, %v790_v6  ;;  %v355_v0 = vld [vmem:[%s958_s6] sm:$0x1]  ;;  %s792_s6 = smov [#allocation2]  }
   0xd   :  { %736 = vmatprep.subr.bf16.mxu1 %v788_v3  ;;  %v637_v12 = vld [vmem:[%s960_s8] ss:$0 sm:$0xff]  ;;  %s622_s24 = sshll.u32 %s792_s6, 4  ;;  %s623_s24 = int_to_ptr.vmem [resolvable:$true] %s622_s24 }
   0xe   :  { %s764_s25 = scalar_lea.vmem %s623_s24, 128  ;;  %p769_p1 = scmp.lt.s32.totalorder %s623_s24, %s623_s24 }
   0xf   :  { %p765_p0 = scmp.ne.s32.totalorder %s623_s24, %s764_s25  ;;  %p770_p2 = scmp.lt.s32.totalorder %s764_s25, %s764_s25 }
  0x10   :  { %738 = vmatpush3.bf16.msra.mxu1 %v737_v14 }
  0x11   :  { %693 = vmatprep.subr.mxu1 %v790_v6  ;;  %p771_p3 = por %p770_p2, %p769_p1 }
  0x13   :  { %686 = vmatmul.mubr.msk.f32.vlgmr.msra.gmra.mrb[2].mxu1 %vm38_vm1, %v33_v10  ;;  %p772_p4 = pnand %p771_p3, %p765_p0 }
  0x14   :  { %695 = vmatprep.mubr.msk.f32.mxu1 %vm789_vm0, %v790_v6 }
  0xde   :  { %v878_v15 = vpop.f32.mrb[0].mxu1 }
  0xdf   :  { %v262_v16 = vmul.f32 %v878_v15, %v878_v15  ;;  %v676_v17 = vpop.f32.mrb[1].mxu1  ;;  %689 = vmatpush3.msra.mxu0 %v878_v15 }
  0xe0   :  { %691 = vmatmul.mubr.msk.f32.vlgmr.msra.gmra.mrb[0].mxu0 %vm188_vm2, %v791_v18  ;;  %698 = vmatprep.subr.mxu0 %v790_v6 }
  0xe1   :  { %694 = vmatpush3.msra.mxu1 %v262_v16  ;;  %700 = vmatprep.mubr.msk.f32.mxu0 %vm789_vm0, %v790_v6 }
  0xe2   :  { %696 = vmatmul.mubr.msk.f32.vlgmr.msra.gmra.mrb[4].mxu1 %vm188_vm2, %v791_v18  ;;  %703 = vmatprep.subr.mxu1 %v790_v6 }
  0xe3   :  { %705 = vmatprep.mubr.msk.f32.mxu1 %vm789_vm0, %v790_v6 }
  0xe6   :  { %v887_v19 = vpop.f32.mrb[2].mxu1 }
  0xe7   :  { %v426_v20 = vmul.f32 %v887_v19, %v887_v19  ;;  %v687_v21 = vpop.f32.mrb[3].mxu1  ;;  %699 = vmatpush3.msra.mxu0 %v887_v19 }
  0xe8   :  { %701 = vmatmul.mubr.msk.f32.vlgmr.msra.gmra.mrb[2].mxu0 %vm188_vm2, %v791_v18  ;;  %739 = vmatprep.subr.bf16.mxu0 %v788_v3 }
  0xe9   :  { %704 = vmatpush3.msra.mxu1 %v426_v20  ;;  %724 = vmatprep.mubr.msk.f32.mxu0 %vm789_vm0, %v790_v6 }
  0xea   :  { %706 = vmatmul.mubr.msk.f32.vlgmr.msra.gmra.mrb[6].mxu1 %vm188_vm2, %v791_v18  ;;  %741 = vmatpush3.bf16.msra.mxu0 %v740_v24 }
  0xeb   :  { %742 = vmatprep.subr.bf16.mxu0 %v788_v3 }
  0xee   :  { %744 = vmatpush3.bf16.msra.mxu0 %v743_v27 }
  0xef   :  { %745 = vmatprep.subr.bf16.mxu0 %v788_v3 }
  0xf2   :  { %747 = vmatpush3.bf16.msra.mxu0 %v746_v30 }
  0xf3   :  { %748 = vmatprep.subr.bf16.mxu0 %v788_v3 }
  0xf6   :  { %750 = vmatpush3.bf16.msra.mxu0 %v749_v33 }
 0x1b3   :  { %v258_v34 = vpop.f32.mrb[0].mxu0 }
 0x1b4   :  { %v333_v35 = vmul.f32 %v258_v34, %v258_v34  ;;  %v692_v36 = vpop.f32.mrb[1].mxu0 }
 0x1b5   :  { %v329_v37 = vpop.f32.mrb[4].mxu1 }
 0x1b6   :  { %v334_v38 = vsub.f32 %v329_v37, %v333_v35  ;;  %v697_v39 = vpop.f32.mrb[5].mxu1 }
 0x1b8   :  { %v335_v40 = vadd.f32 1e-05, %v334_v38 }
 0x1ba   :  { %756 = vrsqrt.f32 %v335_v40 }
 0x1bb   :  { %v422_v42 = vpop.f32.mrb[2].mxu0 }
 0x1bc   :  { %v497_v43 = vmul.f32 %v422_v42, %v422_v42  ;;  %v702_v44 = vpop.f32.mrb[3].mxu0 }
 0x1bd   :  { %v493_v45 = vpop.f32.mrb[6].mxu1 }
 0x1be   :  { %v498_v46 = vsub.f32 %v493_v45, %v497_v43  ;;  %v707_v47 = vpop.f32.mrb[7].mxu1 }
 0x1c0   :  { %v499_v49 = vadd.f32 1e-05, %v498_v46 }
 0x1c2   :  { %758 = vrsqrt.f32 %v499_v49 }
 0x1c4   :  { %v757_v52 = vpop.eup %756 }
 0x1c5   :  { %v337_v53 = vmul.f32 %v757_v52, %v186_v50 }
 0x1c7   :  { %v338_v55 = vmul.f32 %v337_v53, %v258_v34  ;;  %v344_v56 = vrot.slane %v337_v53, %v343_v51 }
 0x1c9   :  { %v339_v57 = vsub.f32 %v187_v54, %v338_v55  ;;  %v346_v58 = vmul.f32 %v344_v56, %v878_v15 }
 0x1cb   :  { %v351_v60 = vrot.slane %v339_v57, %v343_v51 }
 0x1cc   :  { %v759_v61 = vpop.eup %758 }
 0x1cd   :  { %v501_v62 = vmul.f32 %v759_v61, %v354_v59  ;;  %v353_v63 = vadd.f32 %v351_v60, %v346_v58 }
 0x1cf   :  { %v502_v1 = vmul.f32 %v501_v62, %v422_v42  ;;  %v508_v2 = vrot.slane %v501_v62, %v343_v51 }
 0x1d1   :  { %v503_v3 = vsub.f32 %v355_v0, %v502_v1  ;;  %v510_v4 = vmul.f32 %v508_v2, %v887_v19 }
 0x1d3   :  { %v515_v5 = vrot.slane %v503_v3, %v343_v51 }
 0x1d5   :  { %v517_v6 = vadd.f32 %v515_v5, %v510_v4 }
 0x1d7   :  { %v636_v7 = vmul.f32 -1.442695, %v517_v6 }
 0x1d9   :  { %760 = vpow2.f32 %v636_v7 }
 0x1e3   :  { %v761_v8 = vpop.eup %760 }
 0x1e4   :  { %v521_v9 = vadd.f32 1.0, %v761_v8 }
 0x1e6   :  { %762 = vrcp.f32 %v521_v9 }
 0x1f0   :  { %v763_v10 = vpop.eup %762 }
 0x1f1   :  { %v524_v11 = vmul.f32 %v763_v10, %v353_v63 }
 0x1f3   :  { %725 = vmatmul.mubr.msk.f32.vlgmr.msra.gmra.mrb[4].mxu0 %vm540_vm3, %v524_v11 }
 0x2c6   :  { %v610_v13 = vpop.f32.mrb[4].mxu0 }
 0x2c7   :  { %v611_v14 = vadd.f32 %v637_v12, %v610_v13  ;;  %v726_v15 = vpop.f32.mrb[5].mxu0 }
 0x2c9   :  { %615 = vst.msk [vmem:[#allocation2] sm:$0xff] %vm614_vm4, %v611_v14 }
 0x2ca   :  { %775 = shalt.err (!%p772_p4)
}
 0x2cb   :  { %s776_s26 = scalar_lea.hbm %s961_s9, 128 }
 0x2cc   :  { %p777_p5 = scmp.ne.s32.totalorder %s961_s9, %s776_s26  ;;  %p780_p6 = scmp.lt.u32.totalorder %s776_s26, %s961_s9 }
 0x2ce   :  { %p782_p7 = pnand %p780_p6, %p777_p5 }
 0x2d0   :  { %785 = shalt.err (!%p782_p7)
}
 0x2d1   :  { %625 = dma.vmem_to_hbm [thread:$0]  %s623_s24, 128, %s961_s9, [#allocation3]  }
 0x2d2   :  { %786 = dma.done.wait [#allocation3], 128  }
 0x2d3   :  { %787 = vsyncadd [#allocation3], 4294967168 }
 0x2d4   :  { %629 = vsyncpa [#allocation3], 1 }

</bundles_post_ra>
